<compile_context>
chip_gen: v7x
topology: tpu7x:2x2x1
jax: 0.10.0
libtpu: 0.0.40
codegen_flags: <defaults>
</compile_context>

<pallas_src>
import math

import jax
import jax.numpy as jnp
from jax.experimental import pallas as pl
from jax.experimental.pallas import tpu as pltpu


def _cdiv(a, b):
    return -(-a // b)


def _vmem_capacity_bytes():
    """Generation-aware VMEM capacity; conservative fallback (v7x per-TC)."""
    try:
        return int(pltpu.get_tpu_info().vmem_capacity_bytes)
    except Exception:
        return 64 * 1024 * 1024


def _make_fusion_kernel(num_inputs):
    def kernel(w_ref, *refs):
        # w_ref: (num_inputs,) softmax-normalized weights in SMEM (scalar prefetch)
        # refs[:num_inputs]: per-input (tm, tn) VMEM tiles
        # refs[num_inputs]:  (tm, tn) output tile
        in_refs = refs[:num_inputs]
        o_ref = refs[num_inputs]
        acc = in_refs[0][...].astype(jnp.float32) * w_ref[0]
        for i in range(1, num_inputs):
            acc = acc + in_refs[i][...].astype(jnp.float32) * w_ref[i]
        o_ref[...] = acc.astype(o_ref.dtype)

    return kernel


def _plan(total, itemsize, num_inputs):
    """Pick (tn, tm, rows) for a (rows, tn) slab view of `total` elements.

    Returns None when `total` has no 128-multiple lane factor (rare fallback).
    """
    sub = max(8, 32 // itemsize)  # sublane multiple (8 for 32-bit, 16 for 16-bit)
    cap = _vmem_capacity_bytes()
    budget = cap // 2                              # leave headroom for Mosaic scratch
    per_buf = budget // (2 * (num_inputs + 1))     # double-buffered, N inputs + 1 output

    # Explicit guard instead of silently clamping past the VMEM budget.
    if per_buf < sub * 128 * itemsize:
        raise ValueError(
            f"WeightedFusion: {num_inputs} inputs do not fit the VMEM budget "
            f"({cap} bytes); split the fusion into multiple passes."
        )

    for tn in (1024, 512, 256, 128):
        if total % tn != 0:
            continue
        if per_buf < sub * tn * itemsize:
            continue  # too many inputs for this lane width; try a narrower slab
        rows = total // tn
        if rows <= sub:
            return tn, rows, rows  # single full-array block (legal BlockSpec)
        tm = per_buf // (tn * itemsize)
        # Big-tile cap: 1024 rows only when the grid remains long (amortizes
        # the ~0.35us/step pipeline overhead -- mostly a v7x win), else 512.
        tm = min(tm, 1024 if _cdiv(rows, 1024) >= 8 else 512)
        # Keep >= 4 grid steps (2 TCs x 2 pipeline buffers on v7x) whenever
        # the input is large enough to allow it.
        while tm > sub and _cdiv(rows, tm) < 4:
            tm //= 2
        tm = max(sub, (tm // sub) * sub)
        tm = min(tm, rows)
        return tn, tm, rows
    return None


def _run_fusion(slabs, w_norm, *, rows, tn, tm, itemsize):
    n = len(slabs)
    dtype = slabs[0].dtype
    grid = (_cdiv(rows, tm),)          # ragged last row-block is clipped by Pallas
    block = (tm, tn)
    in_specs = [pl.BlockSpec(block, lambda i, w: (i, 0)) for _ in range(n)]
    out_spec = pl.BlockSpec(block, lambda i, w: (i, 0))

    # VMEM limit derived from the actual plan (+ margin), capped below capacity.
    tile_bytes = 2 * (n + 1) * tm * tn * itemsize
    vmem_limit = max(16 * 1024 * 1024, tile_bytes + 4 * 1024 * 1024)
    vmem_limit = min(vmem_limit, int(_vmem_capacity_bytes() * 0.9))

    return pl.pallas_call(
        _make_fusion_kernel(n),
        out_shape=jax.ShapeDtypeStruct((rows, tn), dtype),
        grid_spec=pltpu.PrefetchScalarGridSpec(
            num_scalar_prefetch=1,
            grid=grid,
            in_specs=in_specs,
            out_specs=out_spec,
        ),
        compiler_params=pltpu.CompilerParams(
            dimension_semantics=("parallel",),
            vmem_limit_bytes=vmem_limit,
        ),
    )(w_norm, *slabs)


def weighted_fusion(inputs, fusion_weights):
    """inputs: list of same-shape/dtype arrays (e.g. (B, C, H, W)).
    fusion_weights: (num_inputs,) float32 raw logits (the nn.Parameter)."""
    n = len(inputs)
    assert n >= 1
    assert fusion_weights.shape == (n,)
    shape = inputs[0].shape
    dtype = inputs[0].dtype
    for x in inputs:
        assert x.shape == shape and x.dtype == dtype

    total = math.prod(shape)
    itemsize = jnp.dtype(dtype).itemsize

    # Softmax over N logits is negligible: do it once in XLA and ship the
    # normalized weights to SMEM as scalars.
    w_norm = jax.nn.softmax(fusion_weights.astype(jnp.float32))

    plan = _plan(total, itemsize, n)
    if plan is not None:
        tn, tm, rows = plan
        slabs = [x.reshape(rows, tn) for x in inputs]   # metadata-only reshape
        out = _run_fusion(slabs, w_norm, rows=rows, tn=tn, tm=tm, itemsize=itemsize)
        return out.reshape(shape)

    # Rare fallback: element count not a multiple of 128 -> minimal zero-pad
    # (zeros contribute nothing to the weighted sum) + output slice.
    pad_total = _cdiv(total, 1024) * 1024
    tn, tm, rows = _plan(pad_total, itemsize, n)
    slabs = [
        jnp.pad(x.reshape(total), (0, pad_total - total)).reshape(rows, tn)
        for x in inputs
    ]
    out = _run_fusion(slabs, w_norm, rows=rows, tn=tn, tm=tm, itemsize=itemsize)
    return out.reshape(pad_total)[:total].reshape(shape)


if __name__ == "__main__":
    key = jax.random.PRNGKey(0)

    def run_case(case_id, shape, num_inputs):
        k = jax.random.fold_in(key, case_id)
        ks = jax.random.split(k, num_inputs)
        inputs = [jax.random.normal(ks[i], shape, dtype=jnp.float32)
                  for i in range(num_inputs)]
        # Matches nn.Parameter(torch.ones(num_inputs)).
        fusion_weights = jnp.ones((num_inputs,), dtype=jnp.float32)

        fused = jax.block_until_ready(weighted_fusion(inputs, fusion_weights))

        sw = jax.nn.softmax(fusion_weights)
        ref = sum(w * x for w, x in zip(sw, inputs))
        assert jnp.allclose(fused, ref, atol=1e-5, rtol=1e-5), shape
        return fused

    # Primary case implied by the module: 3 feature maps of (2, 4, 16, 16).
    run_case(0, (2, 4, 16, 16), 3)
    # Exercise the tiled + ragged-last-row-block (partial block) path.
    run_case(1, (2, 4, 40, 40), 3)
    # Exercise the rare non-128-multiple fallback path.
    run_case(2, (3, 5, 7, 2), 2)

    print("KERNEL_OK")
</pallas_src>

<mosaic_0001>
module attributes {stable_mosaic.version = 11 : i64} {
  func.func @kernel(%arg0: i32, %arg1: memref<3xf32, #tpu.memory_space<smem>>, %arg2: memref<2x1024xf32, #tpu.memory_space<vmem>>, %arg3: memref<2x1024xf32, #tpu.memory_space<vmem>>, %arg4: memref<2x1024xf32, #tpu.memory_space<vmem>>, %arg5: memref<2x1024xf32, #tpu.memory_space<vmem>>) attributes {dimension_semantics = [#tpu.dimension_semantics<parallel>], iteration_bounds = array<i64: 1>, scalar_prefetch = 1 : i64, scratch_operands = 0 : i64, tpu.core_type = #tpu.core_type<tc>, window_params = [{transform_indices = @transform_0, window_bounds = array<i64: 2, 1024>}, {transform_indices = @transform_1, window_bounds = array<i64: 2, 1024>}, {transform_indices = @transform_2, window_bounds = array<i64: 2, 1024>}, {transform_indices = @transform_3, window_bounds = array<i64: 2, 1024>}]} {
    %c0 = arith.constant 0 : index
    %c0_0 = arith.constant 0 : index
    %0 = vector.load %arg2[%c0, %c0_0] : memref<2x1024xf32, #tpu.memory_space<vmem>>, vector<2x1024xf32>
    %c0_1 = arith.constant 0 : index
    %1 = memref.load %arg1[%c0_1] : memref<3xf32, #tpu.memory_space<smem>>
    %2 = vector.broadcast %1 : f32 to vector<2x1024xf32>
    %3 = arith.mulf %0, %2 : vector<2x1024xf32>
    %c0_2 = arith.constant 0 : index
    %c0_3 = arith.constant 0 : index
    %4 = vector.load %arg3[%c0_2, %c0_3] : memref<2x1024xf32, #tpu.memory_space<vmem>>, vector<2x1024xf32>
    %c1 = arith.constant 1 : index
    %5 = memref.load %arg1[%c1] : memref<3xf32, #tpu.memory_space<smem>>
    %6 = vector.broadcast %5 : f32 to vector<2x1024xf32>
    %7 = arith.mulf %4, %6 : vector<2x1024xf32>
    %8 = arith.addf %3, %7 : vector<2x1024xf32>
    %c0_4 = arith.constant 0 : index
    %c0_5 = arith.constant 0 : index
    %9 = vector.load %arg4[%c0_4, %c0_5] : memref<2x1024xf32, #tpu.memory_space<vmem>>, vector<2x1024xf32>
    %c2 = arith.constant 2 : index
    %10 = memref.load %arg1[%c2] : memref<3xf32, #tpu.memory_space<smem>>
    %11 = vector.broadcast %10 : f32 to vector<2x1024xf32>
    %12 = arith.mulf %9, %11 : vector<2x1024xf32>
    %13 = arith.addf %8, %12 : vector<2x1024xf32>
    %c0_6 = arith.constant 0 : index
    %c0_7 = arith.constant 0 : index
    %14 = vector.load %arg5[%c0_6, %c0_7] : memref<2x1024xf32, #tpu.memory_space<vmem>>, vector<2x1024xf32>
    tpu.vector_store %arg5[%c0_6, %c0_7], %13 {strides = array<i32>} : memref<2x1024xf32, #tpu.memory_space<vmem>>, vector<2x1024xf32>,
    return
  }
  func.func @transform_0(%arg0: i32, %arg1: memref<3xf32, #tpu.memory_space<smem>>) -> (i32, i32) {
    %c0_i32 = arith.constant 0 : i32
    %c0_i32_0 = arith.constant 0 : i32
    return %arg0, %c0_i32 : i32, i32
  }
  func.func @transform_1(%arg0: i32, %arg1: memref<3xf32, #tpu.memory_space<smem>>) -> (i32, i32) {
    %c0_i32 = arith.constant 0 : i32
    %c0_i32_0 = arith.constant 0 : i32
    return %arg0, %c0_i32 : i32, i32
  }
  func.func @transform_2(%arg0: i32, %arg1: memref<3xf32, #tpu.memory_space<smem>>) -> (i32, i32) {
    %c0_i32 = arith.constant 0 : i32
    %c0_i32_0 = arith.constant 0 : i32
    return %arg0, %c0_i32 : i32, i32
  }
  func.func @transform_3(%arg0: i32, %arg1: memref<3xf32, #tpu.memory_space<smem>>) -> (i32, i32) {
    %c0_i32 = arith.constant 0 : i32
    %c0_i32_0 = arith.constant 0 : i32
    return %arg0, %c0_i32 : i32, i32
  }
}

</mosaic_0001>

<bundles_post_ra>
// kernel: tpu_custom_call.1
= control target key start
LH: loop header
LB: loop body
LE: loop exit
PB: predicated region body
PF: predicated region fallthrough
CT: control target
= control target key end

     0   :  { %s298_s0 = inlined_call_operand.hbm [shape: f32[3], index: 0, kind: input, shape index: {}]   ;;  %s299_s1 = inlined_call_operand.hbm [shape: f32[2,1024], index: 1, kind: input, shape index: {}]   ;;  %s300_s2 = inlined_call_operand.hbm [shape: f32[2,1024], index: 2, kind: input, shape index: {}]   ;;  %s301_s3 = inlined_call_operand.hbm [shape: f32[2,1024], index: 3, kind: input, shape index: {}]   ;;  %s302_s4 = inlined_call_operand.hbm [shape: f32[2,1024], index: 4, kind: output, shape index: {}]  }
   0x1   :  { %s102_s17 = scalar_lea.hbm %s298_s0, 16 }
   0x2   :  { %p103_p0 = scmp.ne.s32.totalorder %s298_s0, %s102_s17  ;;  %p106_p1 = scmp.lt.u32.totalorder %s102_s17, %s298_s0 }
   0x4   :  { %p108_p2 = pnand %p106_p1, %p103_p0 }
   0x6   :  { %111 = shalt.err (!%p108_p2)  }
   0x7   :  { %s208_s22 = smov [#allocation3]  }
   0x8   :  { %10 = dma.hbm_to_smem %s298_s0, 16, %s208_s22, [#allocation2] }
   0x9   :  { %200 = dma.done.wait [#allocation2], 16 }
   0xa   :  { %201 = vsyncadd [#allocation2], 4294967280 }
   0xb   :  { %12 = sfence }
   0xc   :  { %13 = vsyncpa [#allocation5], 0 }
   0xd   :  { %14 = vsyncpa [#allocation8], 0 }
   0xe   :  { %15 = vsyncpa [#allocation6], 0  ;;  %s209_s25 = smov [#allocation7]   ;;  %s210_s27 = smov [#allocation4]  }
   0xf   :  { %s32_s26 = sshll.u32 %s209_s25, 4  ;;  %s22_s28 = sshll.u32 %s210_s27, 4  ;;  %s33_s26 = int_to_ptr.vmem [resolvable:$true] %s32_s26  ;;  %s23_s28 = int_to_ptr.vmem [resolvable:$true] %s22_s28 }
  0x10   :  { %s112_s5 = scalar_lea.hbm %s300_s2, 256 }
  0x11   :  { %p113_p3 = scmp.ne.s32.totalorder %s300_s2, %s112_s5  ;;  %p116_p4 = scmp.lt.u32.totalorder %s112_s5, %s300_s2 }
  0x13   :  { %p118_p5 = pnand %p116_p4, %p113_p3 }
  0x15   :  { %121 = shalt.err (!%p118_p5)
}
  0x16   :  { %s122_s9 = scalar_lea.vmem %s33_s26, 256  ;;  %p127_p7 = scmp.lt.s32.totalorder %s33_s26, %s33_s26 }
  0x17   :  { %p123_p6 = scmp.ne.s32.totalorder %s33_s26, %s122_s9  ;;  %p128_p8 = scmp.lt.s32.totalorder %s122_s9, %s122_s9 }
  0x19   :  { %p129_p9 = por %p128_p8, %p127_p7 }
  0x1b   :  { %p130_p10 = pnand %p129_p9, %p123_p6 }
  0x1d   :  { %133 = shalt.err (!%p130_p10)
}
  0x1e   :  { %35 = dma.hbm_to_vmem [thread:$0]  %s300_s2, 256, %s33_s26, [#allocation8]  }
  0x1f   :  { %s134_s14 = scalar_lea.hbm %s299_s1, 256 }
  0x20   :  { %p135_p11 = scmp.ne.s32.totalorder %s299_s1, %s134_s14  ;;  %p138_p12 = scmp.lt.u32.totalorder %s134_s14, %s299_s1 }
  0x22   :  { %p140_p13 = pnand %p138_p12, %p135_p11 }
  0x24   :  { %143 = shalt.err (!%p140_p13)
}
  0x25   :  { %s144_s19 = scalar_lea.vmem %s23_s28, 256  ;;  %p149_p1 = scmp.lt.s32.totalorder %s23_s28, %s23_s28 }
  0x26   :  { %p145_p0 = scmp.ne.s32.totalorder %s23_s28, %s144_s19  ;;  %p150_p2 = scmp.lt.s32.totalorder %s144_s19, %s144_s19 }
  0x28   :  { %p151_p3 = por %p150_p2, %p149_p1 }
  0x2a   :  { %p152_p4 = pnand %p151_p3, %p145_p0 }
  0x2c   :  { %155 = shalt.err (!%p152_p4)
}
  0x2d   :  { %25 = dma.hbm_to_vmem [thread:$0]  %s299_s1, 256, %s23_s28, [#allocation5]  }
  0x2e   :  { %s211_s21 = smov [#allocation9]   ;;  %s156_s25 = scalar_lea.hbm %s301_s3, 256 }
  0x2f   :  { %s42_s22 = sshll.u32 %s211_s21, 4  ;;  %p157_p5 = scmp.ne.s32.totalorder %s301_s3, %s156_s25  ;;  %s43_s22 = int_to_ptr.vmem [resolvable:$true] %s42_s22 }
  0x30   :  { %p160_p6 = scmp.lt.u32.totalorder %s156_s25, %s301_s3 }
  0x32   :  { %p162_p7 = pnand %p160_p6, %p157_p5 }
  0x34   :  { %165 = shalt.err (!%p162_p7)
}
  0x35   :  { %s166_s5 = scalar_lea.vmem %s43_s22, 256  ;;  %p171_p9 = scmp.lt.s32.totalorder %s43_s22, %s43_s22 }
  0x36   :  { %p167_p8 = scmp.ne.s32.totalorder %s43_s22, %s166_s5  ;;  %p172_p10 = scmp.lt.s32.totalorder %s166_s5, %s166_s5 }
  0x38   :  { %p173_p11 = por %p172_p10, %p171_p9 }
  0x3a   :  { %p174_p12 = pnand %p173_p11, %p167_p8 }
  0x3c   :  { %177 = shalt.err (!%p174_p12)
}
  0x3d   :  { %45 = dma.hbm_to_vmem [thread:$0]  %s301_s3, 256, %s43_s22, [#allocation8]  }
  0x3e   :  { %202 = dma.done.wait [#allocation5], 256  }
  0x3f   :  { %203 = vsyncadd [#allocation5], 4294967040 }
  0x40   :  { %204 = dma.done.wait [#allocation8], 512  }
  0x41   :  { %205 = vsyncadd [#allocation8], 4294966784  ;;  %s57_s6 = sld [smem:[#allocation3]]  ;;  %s95_s7 = sld [smem:[#allocation3 + $0x1]]  ;;  %v55_v0 = vld [vmem:[#allocation4] sm:$0xff]  ;;  %v61_v2 = vld [vmem:[#allocation7] sm:$0xff] }
  0x42   :  { %s96_s0 = sld [smem:[#allocation3 + $0x2]]  ;;  %v69_v4 = vld [vmem:[#allocation9] sm:$0xff]  ;;  %v56_v8 = vld [vmem:[#allocation4 + $0x8] sm:$0xff]  ;;  %v62_v9 = vld [vmem:[#allocation7 + $0x8] sm:$0xff]  ;;  %s212_s3 = smov [#allocation10]  }
  0x43   :  { %v70_v10 = vld [vmem:[#allocation9 + $0x8] sm:$0xff]  ;;  %s85_s8 = sshll.u32 %s212_s3, 4  ;;  %s86_s8 = int_to_ptr.vmem [resolvable:$true] %s85_s8 }
  0x44   :  { %s178_s9 = scalar_lea.vmem %s86_s8, 256  ;;  %p183_p0 = scmp.lt.s32.totalorder %s86_s8, %s86_s8 }
  0x45   :  { %p179_p13 = scmp.ne.s32.totalorder %s86_s8, %s178_s9  ;;  %p184_p1 = scmp.lt.s32.totalorder %s178_s9, %s178_s9 }
  0x47   :  { %v58_v1 = vstv %s57_s6  ;;  %v64_v3 = vstv %s95_s7  ;;  %p185_p2 = por %p184_p1, %p183_p0 }
  0x48   :  { %v59_v5 = vmul.f32 %v58_v1, %v55_v0  ;;  %v65_v6 = vmul.f32 %v64_v3, %v61_v2  ;;  %v72_v7 = vstv %s96_s0  ;;  %v60_v12 = vmul.f32 %v58_v1, %v56_v8 }
  0x49   :  { %v73_v11 = vmul.f32 %v72_v7, %v69_v4  ;;  %v66_v13 = vmul.f32 %v64_v3, %v62_v9  ;;  %v74_v14 = vmul.f32 %v72_v7, %v70_v10  ;;  %p186_p3 = pnand %p185_p2, %p179_p13 }
  0x4a   :  { %v67_v15 = vadd.f32 %v65_v6, %v59_v5 }
  0x4b   :  { %v68_v16 = vadd.f32 %v66_v13, %v60_v12 }
  0x4c   :  { %v75_v17 = vadd.f32 %v73_v11, %v67_v15 }
  0x4d   :  { %v76_v18 = vadd.f32 %v74_v14, %v68_v16 }
  0x4e   :  { %77 = vst [vmem:[#allocation10] sm:$0xff] %v75_v17 }
  0x4f   :  { %78 = vst [vmem:[#allocation10 + $0x8] sm:$0xff] %v76_v18 }
  0x50   :  { %189 = shalt.err (!%p186_p3)
}
  0x51   :  { %s190_s12 = scalar_lea.hbm %s302_s4, 256 }
  0x52   :  { %p191_p4 = scmp.ne.s32.totalorder %s302_s4, %s190_s12  ;;  %p194_p5 = scmp.lt.u32.totalorder %s190_s12, %s302_s4 }
  0x54   :  { %p196_p6 = pnand %p194_p5, %p191_p4 }
  0x56   :  { %199 = shalt.err (!%p196_p6)
}
  0x57   :  { %88 = dma.vmem_to_hbm [thread:$0]  %s86_s8, 256, %s302_s4, [#allocation6]  }
  0x58   :  { %206 = dma.done.wait [#allocation6], 256  }
  0x59   :  { %207 = vsyncadd [#allocation6], 4294967040 }
  0x5a   :  { %92 = vsyncpa [#allocation5], 1 }
  0x5b   :  { %93 = vsyncpa [#allocation8], 1 }
  0x5c   :  { %94 = vsyncpa [#allocation6], 1 }

</bundles_post_ra>
